<compile_context>
chip_gen: v7x
topology: tpu7x:2x2x1
jax: 0.10.0
libtpu: 0.0.40
codegen_flags: <defaults>
</compile_context>

<pallas_src>
import functools

import jax
import jax.numpy as jnp
from jax.experimental import pallas as pl
from jax.experimental.pallas import tpu as pltpu


# Feed the MXU bf16 operands (f32 accumulation + f32 elementwise math).
# Set to False for a bit-faithful f32 forward pass.
MXU_BF16 = True
_MXU_DTYPE = jnp.bfloat16 if MXU_BF16 else jnp.float32


# --------------------------------------------------------------------------
# Helpers
# --------------------------------------------------------------------------

def _erf(x):
    # Abramowitz & Stegun 7.1.26 polynomial erf, |err| <= 1.5e-7
    # (exact-GELU semantics of nn.GELU() up to f32 round-off).
    a1, a2, a3, a4, a5 = 0.254829592, -0.284496736, 1.421413741, -1.453152027, 1.061405429
    p = 0.3275911
    sgn = jnp.where(x >= 0.0, 1.0, -1.0)
    ax = jnp.abs(x)
    t = 1.0 / (1.0 + p * ax)
    poly = ((((a5 * t + a4) * t + a3) * t + a2) * t + a1) * t
    return sgn * (1.0 - poly * jnp.exp(-ax * ax))


def _gelu_exact(x):
    return 0.5 * x * (1.0 + _erf(x * 0.7071067811865476))


def _pick_row_tile(R, max_tile):
    """Largest multiple of 8 <= max_tile that divides R, else R (single block)."""
    if R <= max_tile:
        return R
    t = (max_tile // 8) * 8
    while t >= 8:
        if R % t == 0:
            return t
        t -= 8
    return R


# --------------------------------------------------------------------------
# Pallas kernels
# --------------------------------------------------------------------------

def mlp_block_kernel(y_ref, res_ref, lnw_ref, lnb_ref, w1_ref, b1_ref,
                     w2_ref, b2_ref, g_ref, o_ref):
    """Fused ConvNeXt block tail on a (TR, C) row tile:
       LN -> pwconv1 -> GELU -> pwconv2 -> gamma -> +residual."""
    x = y_ref[...].astype(jnp.float32)
    mu = jnp.mean(x, axis=-1, keepdims=True)
    var = jnp.mean((x - mu) ** 2, axis=-1, keepdims=True)
    xn = (x - mu) * jax.lax.rsqrt(var + 1e-6)
    xn = xn * lnw_ref[...] + lnb_ref[...]
    h = jnp.dot(xn.astype(w1_ref.dtype), w1_ref[...],
                preferred_element_type=jnp.float32) + b1_ref[...]
    h = _gelu_exact(h)
    z = jnp.dot(h.astype(w2_ref.dtype), w2_ref[...],
                preferred_element_type=jnp.float32) + b2_ref[...]
    z = z * g_ref[...]
    o_ref[...] = (res_ref[...].astype(jnp.float32) + z).astype(o_ref.dtype)


def layernorm_kernel(x_ref, w_ref, b_ref, o_ref):
    """LayerNorm over the last dim (biased variance, eps=1e-6), affine."""
    x = x_ref[...].astype(jnp.float32)
    mu = jnp.mean(x, axis=-1, keepdims=True)
    var = jnp.mean((x - mu) ** 2, axis=-1, keepdims=True)
    xn = (x - mu) * jax.lax.rsqrt(var + 1e-6)
    o_ref[...] = (xn * w_ref[...] + b_ref[...]).astype(o_ref.dtype)


def matmul_bias_kernel(x_ref, w_ref, b_ref, o_ref):
    y = jnp.dot(x_ref[...].astype(w_ref.dtype), w_ref[...],
                preferred_element_type=jnp.float32) + b_ref[...]
    o_ref[...] = y.astype(o_ref.dtype)


def gap_kernel(x_ref, o_ref):
    """Global average pool over the flattened spatial axis for one batch elem."""
    o_ref[...] = jnp.mean(x_ref[0].astype(jnp.float32), axis=0,
                          keepdims=True).astype(o_ref.dtype)


def dwconv_kernel(x_ref, w_ref, b_ref, o_ref, pad_ref, *, kh, kw, H, W):
    """Depthwise 'same' conv on one batch element (NHWC).  The halo is built
    in a zero-filled VMEM scratch; taps are ref-sliced shift-mul-adds."""
    ph, pw = kh // 2, kw // 2
    pad_ref[...] = jnp.zeros_like(pad_ref)
    pad_ref[ph:ph + H, pw:pw + W, :] = x_ref[0].astype(jnp.float32)
    acc = jnp.zeros((H, W, o_ref.shape[-1]), jnp.float32)
    for dh in range(kh):                       # static unroll over taps
        for dw in range(kw):
            acc = acc + (pad_ref[dh:dh + H, dw:dw + W, :]
                         * w_ref[dh:dh + 1, dw:dw + 1, :])
    o_ref[0] = (acc + b_ref[...]).astype(o_ref.dtype)


def gc_dwconv_kernel(x_ref, wv_ref, wh_ref, b_ref, o_ref, pad_ref, *, gks, H, W):
    """Fused GCHW conv on one batch element, full-C lanes.
    wv has zeros on the second half of channels (acts as the (gks,1) vertical
    conv on the first half); wh has zeros on the first half (the (1,gks)
    horizontal conv on the second half).  This avoids the half-lane split and
    the channel concat HBM round trip."""
    p = gks // 2
    pad_ref[...] = jnp.zeros_like(pad_ref)
    pad_ref[p:p + H, p:p + W, :] = x_ref[0].astype(jnp.float32)
    acc = jnp.zeros((H, W, o_ref.shape[-1]), jnp.float32)
    for t in range(gks):                       # static unroll over taps
        acc = acc + pad_ref[t:t + H, p:p + W, :] * wv_ref[t:t + 1, :]   # vertical
        acc = acc + pad_ref[p:p + H, t:t + W, :] * wh_ref[t:t + 1, :]   # horizontal
    o_ref[0] = (acc + b_ref[...]).astype(o_ref.dtype)


# --------------------------------------------------------------------------
# Pallas wrappers
# --------------------------------------------------------------------------

def pl_mlp_block(y2d, res2d, lnw, lnb, w1, b1, w2, b2, gamma):
    R, C = y2d.shape
    H4 = w1.shape[1]
    TR = _pick_row_tile(R, 256)
    w1c = w1.astype(_MXU_DTYPE)
    w2c = w2.astype(_MXU_DTYPE)
    return pl.pallas_call(
        mlp_block_kernel,
        out_shape=jax.ShapeDtypeStruct((R, C), y2d.dtype),
        grid=(R // TR,),
        in_specs=[
            pl.BlockSpec((TR, C), lambda i: (i, 0)),
            pl.BlockSpec((TR, C), lambda i: (i, 0)),
            pl.BlockSpec((1, C), lambda i: (0, 0)),
            pl.BlockSpec((1, C), lambda i: (0, 0)),
            pl.BlockSpec((C, H4), lambda i: (0, 0)),
            pl.BlockSpec((1, H4), lambda i: (0, 0)),
            pl.BlockSpec((H4, C), lambda i: (0, 0)),
            pl.BlockSpec((1, C), lambda i: (0, 0)),
            pl.BlockSpec((1, C), lambda i: (0, 0)),
        ],
        out_specs=pl.BlockSpec((TR, C), lambda i: (i, 0)),
        compiler_params=pltpu.CompilerParams(
            dimension_semantics=("parallel",),
            vmem_limit_bytes=56 * 1024 * 1024),
    )(y2d, res2d, lnw.reshape(1, C), lnb.reshape(1, C),
      w1c, b1.reshape(1, H4), w2c, b2.reshape(1, C), gamma.reshape(1, C))


def pl_layernorm(x2d, w, b):
    R, C = x2d.shape
    TR = _pick_row_tile(R, 512)
    return pl.pallas_call(
        layernorm_kernel,
        out_shape=jax.ShapeDtypeStruct((R, C), x2d.dtype),
        grid=(R // TR,),
        in_specs=[pl.BlockSpec((TR, C), lambda i: (i, 0)),
                  pl.BlockSpec((1, C), lambda i: (0, 0)),
                  pl.BlockSpec((1, C), lambda i: (0, 0))],
        out_specs=pl.BlockSpec((TR, C), lambda i: (i, 0)),
        compiler_params=pltpu.CompilerParams(dimension_semantics=("parallel",)),
    )(x2d, w.reshape(1, C), b.reshape(1, C))


def pl_matmul_bias(x, w, b):
    M, K = x.shape
    N = w.shape[1]
    TM = _pick_row_tile(M, 512)
    wc = w.astype(_MXU_DTYPE)
    return pl.pallas_call(
        matmul_bias_kernel,
        out_shape=jax.ShapeDtypeStruct((M, N), x.dtype),
        grid=(M // TM,),
        in_specs=[pl.BlockSpec((TM, K), lambda i: (i, 0)),
                  pl.BlockSpec((K, N), lambda i: (0, 0)),
                  pl.BlockSpec((1, N), lambda i: (0, 0))],
        out_specs=pl.BlockSpec((TM, N), lambda i: (i, 0)),
        compiler_params=pltpu.CompilerParams(dimension_semantics=("parallel",)),
    )(x, wc, b.reshape(1, N))


def pl_gap(x3d):
    B, HW, C = x3d.shape
    return pl.pallas_call(
        gap_kernel,
        out_shape=jax.ShapeDtypeStruct((B, C), x3d.dtype),
        grid=(B,),
        in_specs=[pl.BlockSpec((1, HW, C), lambda n: (n, 0, 0))],
        out_specs=pl.BlockSpec((1, C), lambda n: (n, 0)),
        compiler_params=pltpu.CompilerParams(dimension_semantics=("parallel",)),
    )(x3d)


def pl_dwconv(x, w, b):
    """Depthwise 'same' conv. x: [B,H,W,C] NHWC, w: [kh,kw,C], b: [C]. kh,kw odd."""
    # TODO(synk): also tile spatially (B x H-strip grid with halo rows) for
    # better pipelining at large H,W; batch-only tiling kept for simplicity.
    B, H, W, C = x.shape
    kh, kw = int(w.shape[0]), int(w.shape[1])
    assert kh % 2 == 1 and kw % 2 == 1, "odd kernel sizes keep spatial size (as in reference config)"
    ph, pw = kh // 2, kw // 2
    kern = functools.partial(dwconv_kernel, kh=kh, kw=kw, H=H, W=W)
    return pl.pallas_call(
        kern,
        out_shape=jax.ShapeDtypeStruct((B, H, W, C), x.dtype),
        grid=(B,),
        in_specs=[
            pl.BlockSpec((1, H, W, C), lambda n: (n, 0, 0, 0)),
            pl.BlockSpec((kh, kw, C), lambda n: (0, 0, 0)),
            pl.BlockSpec((1, C), lambda n: (0, 0)),
        ],
        out_specs=pl.BlockSpec((1, H, W, C), lambda n: (n, 0, 0, 0)),
        scratch_shapes=[pltpu.VMEM((H + 2 * ph, W + 2 * pw, C), jnp.float32)],
        compiler_params=pltpu.CompilerParams(dimension_semantics=("parallel",)),
    )(x, w, b.reshape(1, C))


def pl_gc_dwconv(x, wv_half, wh_half, bh, bw):
    """Fused GCHW global conv: (gks,1) depthwise on channels [0:C/2] and
    (1,gks) depthwise on channels [C/2:C], computed on full-C lanes with
    zero-masked weight halves (no split/concat HBM round trips)."""
    B, H, W, C = x.shape
    gks = int(wv_half.shape[0])
    assert gks % 2 == 1, "odd global kernel size keeps spatial size (as in reference config)"
    p = gks // 2
    C2 = C // 2
    zeros = jnp.zeros((gks, C2), wv_half.dtype)
    wv = jnp.concatenate([wv_half, zeros], axis=1)       # vertical taps -> first half
    wh = jnp.concatenate([zeros, wh_half], axis=1)       # horizontal taps -> second half
    bias = jnp.concatenate([bh, bw]).reshape(1, C)
    kern = functools.partial(gc_dwconv_kernel, gks=gks, H=H, W=W)
    return pl.pallas_call(
        kern,
        out_shape=jax.ShapeDtypeStruct((B, H, W, C), x.dtype),
        grid=(B,),
        in_specs=[
            pl.BlockSpec((1, H, W, C), lambda n: (n, 0, 0, 0)),
            pl.BlockSpec((gks, C), lambda n: (0, 0)),
            pl.BlockSpec((gks, C), lambda n: (0, 0)),
            pl.BlockSpec((1, C), lambda n: (0, 0)),
        ],
        out_specs=pl.BlockSpec((1, H, W, C), lambda n: (n, 0, 0, 0)),
        scratch_shapes=[pltpu.VMEM((H + 2 * p, W + 2 * p, C), jnp.float32)],
        compiler_params=pltpu.CompilerParams(dimension_semantics=("parallel",)),
    )(x, wv, wh, bias)


# --------------------------------------------------------------------------
# Model glue (plain JAX: reshapes / patchify)
# --------------------------------------------------------------------------

def patchify_conv(x, w, b, patch):
    """Non-overlapping conv (stride == kernel_size) as patchify + matmul."""
    # TODO(synk): fold the patchify reshape/transpose into the Pallas matmul's
    # BlockSpec index_map to avoid the host-side copy of the activation.
    B, H, W, Cin = x.shape
    Ho, Wo = H // patch, W // patch
    xp = x.reshape(B, Ho, patch, Wo, patch, Cin).transpose(0, 1, 3, 2, 4, 5)
    xp = xp.reshape(B * Ho * Wo, patch * patch * Cin)
    y = pl_matmul_bias(xp, w, b)
    return y.reshape(B, Ho, Wo, w.shape[1])


def layernorm_channels(x, w, b):
    """channels_first LayerNorm of the reference == LN over C in NHWC layout."""
    B, H, W, C = x.shape
    return pl_layernorm(x.reshape(B * H * W, C), w, b).reshape(B, H, W, C)


def convnext_block(x, p):
    # TODO(synk): real-model channel counts (96/192) are not 128-multiples;
    # lane padding of C would remove masked stores but changes param layout.
    B, H, W, C = x.shape
    if p['type'] == 'gc':
        y = pl_gc_dwconv(x, p['wv'], p['wh'], p['bh'], p['bw'])
    else:
        y = pl_dwconv(x, p['dw_w'], p['dw_b'])
    out = pl_mlp_block(y.reshape(B * H * W, C), x.reshape(B * H * W, C),
                       p['ln_w'], p['ln_b'], p['w1'], p['b1'],
                       p['w2'], p['b2'], p['gamma'])
    # drop_path == 0.0 -> Identity (matches reference default)
    return out.reshape(B, H, W, C)


def convnext_gc_forward(x_nchw, params):
    x = jnp.transpose(x_nchw, (0, 2, 3, 1))  # NCHW -> NHWC
    for i in range(4):
        ds = params['downsample'][i]
        if i == 0:
            x = patchify_conv(x, ds['conv_w'], ds['conv_b'], patch=4)
            x = layernorm_channels(x, ds['ln_w'], ds['ln_b'])
        else:
            x = layernorm_channels(x, ds['ln_w'], ds['ln_b'])
            x = patchify_conv(x, ds['conv_w'], ds['conv_b'], patch=2)
        for blk in params['stages'][i]:
            x = convnext_block(x, blk)
    B, H, W, C = x.shape
    pooled = pl_gap(x.reshape(B, H * W, C))                       # x.mean([-2, -1])
    pooled = pl_layernorm(pooled, params['final_ln_w'], params['final_ln_b'])
    logits = pl_matmul_bias(pooled, params['head_w'], params['head_b'])
    return logits


# --------------------------------------------------------------------------
# Deterministic parameter init (matches the module's shapes / init scheme)
# --------------------------------------------------------------------------

def trunc_normal(key, shape, std=0.02):
    return (std * jax.random.truncated_normal(key, -2.0, 2.0, shape)).astype(jnp.float32)


def init_params(key, in_chans, num_classes, depths, dims, gcc_bs_indices, gks_list,
                layer_scale_init_value=1e-6, head_init_scale=1.0):
    keys = iter(jax.random.split(key, 256))
    params = {'downsample': [], 'stages': []}
    # stem: Conv2d(in_chans, dims[0], k=4, s=4) + LN(channels_first)
    params['downsample'].append({
        'conv_w': trunc_normal(next(keys), (4 * 4 * in_chans, dims[0])),
        'conv_b': jnp.zeros((dims[0],), jnp.float32),
        'ln_w': jnp.ones((dims[0],), jnp.float32),
        'ln_b': jnp.zeros((dims[0],), jnp.float32),
    })
    # downsample layers 1..3: LN(channels_first) + Conv2d(k=2, s=2)
    for i in range(1, 4):
        params['downsample'].append({
            'ln_w': jnp.ones((dims[i - 1],), jnp.float32),
            'ln_b': jnp.zeros((dims[i - 1],), jnp.float32),
            'conv_w': trunc_normal(next(keys), (2 * 2 * dims[i - 1], dims[i])),
            'conv_b': jnp.zeros((dims[i],), jnp.float32),
        })
    for i in range(4):
        dim = dims[i]
        blocks = []
        for j in range(depths[i]):
            blk = {
                'ln_w': jnp.ones((dim,), jnp.float32),
                'ln_b': jnp.zeros((dim,), jnp.float32),
                'w1': trunc_normal(next(keys), (dim, 4 * dim)),
                'b1': jnp.zeros((4 * dim,), jnp.float32),
                'w2': trunc_normal(next(keys), (4 * dim, dim)),
                'b2': jnp.zeros((dim,), jnp.float32),
                'gamma': layer_scale_init_value * jnp.ones((dim,), jnp.float32),
            }
            if j < gcc_bs_indices[i]:
                blk['type'] = 'conv'                       # ConvNext_Block (7x7 depthwise)
                blk['dw_w'] = trunc_normal(next(keys), (7, 7, dim))
                blk['dw_b'] = jnp.zeros((dim,), jnp.float32)
            else:
                gks = gks_list[i]                          # ConvNext_GC_Block
                blk['type'] = 'gc'
                blk['wv'] = trunc_normal(next(keys), (gks, dim // 2))  # (gks,1) vertical conv
                blk['bh'] = jnp.zeros((dim // 2,), jnp.float32)
                blk['wh'] = trunc_normal(next(keys), (gks, dim // 2))  # (1,gks) horizontal conv
                blk['bw'] = jnp.zeros((dim // 2,), jnp.float32)
            blocks.append(blk)
        params['stages'].append(blocks)
    params['final_ln_w'] = jnp.ones((dims[-1],), jnp.float32)
    params['final_ln_b'] = jnp.zeros((dims[-1],), jnp.float32)
    params['head_w'] = head_init_scale * trunc_normal(next(keys), (dims[-1], num_classes))
    params['head_b'] = head_init_scale * jnp.zeros((num_classes,), jnp.float32)
    return params


# --------------------------------------------------------------------------

if __name__ == "__main__":
    key = jax.random.PRNGKey(0)
    kx, kp = jax.random.split(key)

    # Small config consistent with the module (scaled down from the defaults).
    B, in_chans, H, W = 2, 3, 32, 32
    num_classes = 10
    depths = [1, 1, 2, 1]
    dims = [8, 16, 32, 64]
    gcc_bs_indices = [1, 1, 1, 0]     # stage2 block1 and stage3 block0 are GC blocks
    # Odd global kernel sizes so 'same' padding preserves spatial size,
    # as in the reference config (GC stages use odd gks there too).
    gks_list = [7, 5, 3, 3]

    x = jax.random.normal(kx, (B, in_chans, H, W), dtype=jnp.float32)   # NCHW, like PyTorch
    params = init_params(kp, in_chans, num_classes, depths, dims,
                         gcc_bs_indices, gks_list)

    logits = convnext_gc_forward(x, params)
    logits = jax.block_until_ready(logits)

    assert logits.shape == (B, num_classes)
    assert bool(jnp.all(jnp.isfinite(logits)))
    print("KERNEL_OK")
</pallas_src>

<mosaic_0001>
module attributes {stable_mosaic.version = 11 : i64} {
  func.func @matmul_bias_kernel(%arg0: i32, %arg1: memref<128x48xf32, #tpu.memory_space<vmem>>, %arg2: memref<48x8xbf16, #tpu.memory_space<vmem>>, %arg3: memref<1x8xf32, #tpu.memory_space<vmem>>, %arg4: memref<128x8xf32, #tpu.memory_space<vmem>>) attributes {dimension_semantics = [#tpu.dimension_semantics<parallel>], iteration_bounds = array<i64: 1>, scalar_prefetch = 0 : i64, scratch_operands = 0 : i64, tpu.core_type = #tpu.core_type<tc>, window_params = [{transform_indices = @transform_0, window_bounds = array<i64: 128, 48>}, {pipeline_mode = #tpu.pipeline_mode<synchronous>, transform_indices = @transform_1, window_bounds = array<i64: 48, 8>}, {pipeline_mode = #tpu.pipeline_mode<synchronous>, transform_indices = @transform_2, window_bounds = array<i64: 1, 8>}, {transform_indices = @transform_3, window_bounds = array<i64: 128, 8>}]} {
    %c0 = arith.constant 0 : index
    %c0_0 = arith.constant 0 : index
    %0 = vector.load %arg1[%c0, %c0_0] : memref<128x48xf32, #tpu.memory_space<vmem>>, vector<128x48xf32>
    %1 = arith.truncf %0 : vector<128x48xf32> to vector<128x48xbf16>
    %c0_1 = arith.constant 0 : index
    %c0_2 = arith.constant 0 : index
    %2 = vector.load %arg2[%c0_1, %c0_2] : memref<48x8xbf16, #tpu.memory_space<vmem>>, vector<48x8xbf16>
    %cst = arith.constant dense<0.000000e+00> : vector<128x8xf32>
    %3 = tpu.matmul %1, %2, %cst {dimension_numbers = #tpu.dot_dimension_numbers<[1], [0], [0], [1], [0, 0, 1, 1], [], []>} : vector<128x48xbf16>, vector<48x8xbf16>, vector<128x8xf32> -> vector<128x8xf32>
    %c0_3 = arith.constant 0 : index
    %c0_4 = arith.constant 0 : index
    %4 = vector.load %arg3[%c0_3, %c0_4] : memref<1x8xf32, #tpu.memory_space<vmem>>, vector<1x8xf32>
    %5 = vector.broadcast %4 : vector<1x8xf32> to vector<128x8xf32>
    %6 = arith.addf %3, %5 : vector<128x8xf32>
    %c0_5 = arith.constant 0 : index
    %c0_6 = arith.constant 0 : index
    %7 = vector.load %arg4[%c0_5, %c0_6] : memref<128x8xf32, #tpu.memory_space<vmem>>, vector<128x8xf32>
    tpu.vector_store %arg4[%c0_5, %c0_6], %6 {strides = array<i32>} : memref<128x8xf32, #tpu.memory_space<vmem>>, vector<128x8xf32>,
    return
  }
  func.func @transform_0(%arg0: i32) -> (i32, i32) {
    %c0_i32 = arith.constant 0 : i32
    %c0_i32_0 = arith.constant 0 : i32
    return %arg0, %c0_i32 : i32, i32
  }
  func.func @transform_1(%arg0: i32) -> (i32, i32) {
    %c0_i32 = arith.constant 0 : i32
    %c0_i32_0 = arith.constant 0 : i32
    %c0_i32_1 = arith.constant 0 : i32
    return %c0_i32, %c0_i32_0 : i32, i32
  }
  func.func @transform_2(%arg0: i32) -> (i32, i32) {
    %c0_i32 = arith.constant 0 : i32
    %c0_i32_0 = arith.constant 0 : i32
    %c0_i32_1 = arith.constant 0 : i32
    return %c0_i32, %c0_i32_0 : i32, i32
  }
  func.func @transform_3(%arg0: i32) -> (i32, i32) {
    %c0_i32 = arith.constant 0 : i32
    %c0_i32_0 = arith.constant 0 : i32
    return %arg0, %c0_i32 : i32, i32
  }
}

</mosaic_0001>

<bundles_post_ra>
// kernel: tpu_custom_call.1
= control target key start
LH: loop header
LB: loop body
LE: loop exit
PB: predicated region body
PF: predicated region fallthrough
CT: control target
= control target key end

     0   :  { %vm70_vm0 = vcmask 392192   ;;  %vm192_vm1 = vcmask 64512   ;;  %s419_s1 = inlined_call_operand.vmem [shape: bf16[48,8], index: 1, kind: input, shape index: {}]   ;;  %s420_s0 = inlined_call_operand.vmem [shape: f32[128,48], index: 0, kind: input, shape index: {}]   ;;  %s421_s2 = inlined_call_operand.vmem [shape: f32[1,8], index: 2, kind: input, shape index: {}]   ;;  %s422_s3 = inlined_call_operand.vmem [shape: f32[128,8], index: 3, kind: output, shape index: {}]  }
   0x1   :  { %v264_v0 = vld [vmem:[%s419_s1] sm:$0xff]   ;;  %v265_v1 = vld [vmem:[%s419_s1 + $0x8] sm:$0xff]   ;;  %v266_v5 = vld [vmem:[%s419_s1 + $0x10] sm:$0xff]  }
   0x2   :  { %236 = vmatprep.subr.bf16.mxu0 %v264_v0  ;;  %258 = vmatprep.subr.bf16.mxu1 %v264_v0  ;;  %v15_v2 = vld [vmem:[%s420_s0] sm:$0xff]  ;;  %v16_v3 = vld [vmem:[%s420_s0 + $0x8] sm:$0xff]  ;;  %v17_v9 = vld [vmem:[%s420_s0 + $0x10] sm:$0xff] }
   0x3   :  { %237 = vmatpush3.bf16.msra.mxu0 %v264_v0  ;;  %261 = vmatpush3.bf16.msra.mxu1 %v264_v0  ;;  %v23_v4 = vld [vmem:[%s420_s0 + $0x40] sm:$0xff]  ;;  %v31_v6 = vpack.c.bf16 %v16_v3, %v15_v2  ;;  %v24_v7 = vld [vmem:[%s420_s0 + $0x48] sm:$0xff]  ;;  %v18_v10 = vld [vmem:[%s420_s0 + $0x18] sm:$0xff] }
   0x4   :  { %238 = vmatprep.subr.bf16.mxu0 %v265_v1  ;;  %259 = vmatprep.subr.bf16.mxu1 %v265_v1  ;;  %v35_v8 = vpack.c.bf16 %v24_v7, %v23_v4  ;;  %v25_v11 = vld [vmem:[%s420_s0 + $0x50] sm:$0xff]  ;;  %v26_v12 = vld [vmem:[%s420_s0 + $0x58] sm:$0xff]  ;;  %v19_v13 = vld [vmem:[%s420_s0 + $0x20] sm:$0xff]  ;;  %v32_v17 = vpack.c.bf16 %v18_v10, %v17_v9 }
   0x5   :  { %242 = vmatprep.mubr.msk.bf16.mxu0 %vm70_vm0, %v31_v6  ;;  %v20_v14 = vld [vmem:[%s420_s0 + $0x28] sm:$0xff]  ;;  %v27_v15 = vld [vmem:[%s420_s0 + $0x60] sm:$0xff]  ;;  %v36_v18 = vpack.c.bf16 %v26_v12, %v25_v11  ;;  %v21_v21 = vld [vmem:[%s420_s0 + $0x30] sm:$0xff] }
   0x6   :  { %v28_v16 = vld [vmem:[%s420_s0 + $0x68] sm:$0xff]  ;;  %250 = vmatprep.mubr.msk.bf16.mxu1 %vm70_vm0, %v35_v8  ;;  %v33_v19 = vpack.c.bf16 %v20_v14, %v19_v13  ;;  %v22_v22 = vld [vmem:[%s420_s0 + $0x38] sm:$0xff]  ;;  %v29_v23 = vld [vmem:[%s420_s0 + $0x70] sm:$0xff] }
   0x7   :  { %239 = vmatpush3.bf16.msra.mxu0 %v265_v1  ;;  %262 = vmatpush3.bf16.msra.mxu1 %v265_v1  ;;  %v37_v20 = vpack.c.bf16 %v28_v16, %v27_v15  ;;  %v30_v24 = vld [vmem:[%s420_s0 + $0x78] sm:$0xff]  ;;  %v34_v25 = vpack.c.bf16 %v22_v22, %v21_v21  ;;  %v213_v27 = vld [vmem:[%s421_s2] ss:$0 sm:$0xff] }
   0x8   :  { %240 = vmatprep.subr.bf16.mxu0 %v266_v5  ;;  %260 = vmatprep.subr.bf16.mxu1 %v266_v5  ;;  %v38_v26 = vpack.c.bf16 %v30_v24, %v29_v23 }
   0xb   :  { %241 = vmatpush3.bf16.msra.mxu0 %v266_v5  ;;  %263 = vmatpush3.bf16.msra.mxu1 %v266_v5 }
   0xe   :  { %243 = vmatmul.mubr.msk.bf16.vlgmr.msra.gmra.mrb[0].mxu0 %vm70_vm0, %v32_v17  ;;  %251 = vmatmul.mubr.msk.bf16.vlgmr.msra.gmra.mrb[0].mxu1 %vm70_vm0, %v36_v18 }
   0xf   :  { %246 = vmatprep.mubr.msk.bf16.mxu0 %vm70_vm0, %v33_v19  ;;  %254 = vmatprep.mubr.msk.bf16.mxu1 %vm70_vm0, %v37_v20 }
  0x16   :  { %247 = vmatmul.mubr.msk.bf16.gmra.mrb[4].mxu0 %vm70_vm0, %v34_v25  ;;  %255 = vmatmul.mubr.msk.bf16.gmra.mrb[4].mxu1 %vm70_vm0, %v38_v26 }
  0xe1   :  { %v244_v28 = vpop.f32.mrb[0].mxu0  ;;  %v252_v29 = vpop.f32.mrb[0].mxu1 }
  0xe2   :  { %v138_v30 = vadd.f32 %v244_v28, %v213_v27  ;;  %v170_v31 = vadd.f32 %v252_v29, %v213_v27  ;;  %v129_v32 = vpop.f32.mrb[1].mxu0  ;;  %v161_v33 = vpop.f32.mrb[1].mxu1 }
  0xe3   :  { %v130_v34 = vadd.f32 %v213_v27, %v129_v32  ;;  %v162_v35 = vadd.f32 %v213_v27, %v161_v33  ;;  %v245_v36 = vpop.f32.mrb[2].mxu0  ;;  %v253_v37 = vpop.f32.mrb[2].mxu1 }
  0xe4   :  { %195 = vst.msk [vmem:[%s422_s3 + $0x10] sm:$0xff] %vm192_vm1, %v138_v30  ;;  %203 = vst.msk [vmem:[%s422_s3 + $0x50] sm:$0xff] %vm192_vm1, %v170_v31  ;;  %v141_v38 = vadd.f32 %v245_v36, %v213_v27  ;;  %v173_v39 = vadd.f32 %v253_v37, %v213_v27  ;;  %v132_v40 = vpop.f32.mrb[3].mxu0  ;;  %v164_v41 = vpop.f32.mrb[3].mxu1 }
  0xe5   :  { %193 = vst.msk [vmem:[%s422_s3] sm:$0xff] %vm192_vm1, %v130_v34  ;;  %201 = vst.msk [vmem:[%s422_s3 + $0x40] sm:$0xff] %vm192_vm1, %v162_v35  ;;  %v133_v42 = vadd.f32 %v213_v27, %v132_v40  ;;  %v165_v43 = vadd.f32 %v213_v27, %v164_v41 }
  0xe6   :  { %196 = vst.msk [vmem:[%s422_s3 + $0x18] sm:$0xff] %vm192_vm1, %v141_v38  ;;  %204 = vst.msk [vmem:[%s422_s3 + $0x58] sm:$0xff] %vm192_vm1, %v173_v39 }
  0xe7   :  { %194 = vst.msk [vmem:[%s422_s3 + $0x8] sm:$0xff] %vm192_vm1, %v133_v42  ;;  %202 = vst.msk [vmem:[%s422_s3 + $0x48] sm:$0xff] %vm192_vm1, %v165_v43 }
  0xe9   :  { %v248_v44 = vpop.f32.mrb[4].mxu0  ;;  %v256_v45 = vpop.f32.mrb[4].mxu1 }
  0xea   :  { %v154_v46 = vadd.f32 %v248_v44, %v213_v27  ;;  %v186_v47 = vadd.f32 %v256_v45, %v213_v27  ;;  %v145_v48 = vpop.f32.mrb[5].mxu0  ;;  %v177_v49 = vpop.f32.mrb[5].mxu1 }
  0xeb   :  { %v146_v50 = vadd.f32 %v213_v27, %v145_v48  ;;  %v178_v51 = vadd.f32 %v213_v27, %v177_v49  ;;  %v249_v52 = vpop.f32.mrb[6].mxu0  ;;  %v257_v53 = vpop.f32.mrb[6].mxu1 }
  0xec   :  { %199 = vst.msk [vmem:[%s422_s3 + $0x30] sm:$0xff] %vm192_vm1, %v154_v46  ;;  %207 = vst.msk [vmem:[%s422_s3 + $0x70] sm:$0xff] %vm192_vm1, %v186_v47  ;;  %v157_v54 = vadd.f32 %v249_v52, %v213_v27  ;;  %v189_v55 = vadd.f32 %v257_v53, %v213_v27  ;;  %v148_v56 = vpop.f32.mrb[7].mxu0  ;;  %v180_v57 = vpop.f32.mrb[7].mxu1 }
  0xed   :  { %197 = vst.msk [vmem:[%s422_s3 + $0x20] sm:$0xff] %vm192_vm1, %v146_v50  ;;  %205 = vst.msk [vmem:[%s422_s3 + $0x60] sm:$0xff] %vm192_vm1, %v178_v51  ;;  %v149_v58 = vadd.f32 %v213_v27, %v148_v56  ;;  %v181_v59 = vadd.f32 %v213_v27, %v180_v57 }
  0xee   :  { %200 = vst.msk [vmem:[%s422_s3 + $0x38] sm:$0xff] %vm192_vm1, %v157_v54  ;;  %208 = vst.msk [vmem:[%s422_s3 + $0x78] sm:$0xff] %vm192_vm1, %v189_v55 }
  0xef   :  { %198 = vst.msk [vmem:[%s422_s3 + $0x28] sm:$0xff] %vm192_vm1, %v149_v58  ;;  %206 = vst.msk [vmem:[%s422_s3 + $0x68] sm:$0xff] %vm192_vm1, %v181_v59 }

</bundles_post_ra>
